<compile_context>
chip_gen: v7x
topology: tpu7x:2x2x1
jax: 0.10.0
libtpu: 0.0.40
codegen_flags: <defaults>
</compile_context>

<pallas_src>
import jax
import jax.numpy as jnp
from jax.experimental import pallas as pl
from jax.experimental.pallas import tpu as pltpu

EPS = 1e-6


def residual_ln_kernel(x_ref, w_ref, p_ref, o_ref):
    # x_ref: (rt, D), w_ref: (D, D) native dtype, p_ref: (3, D) = [bias; gamma; beta]
    x = x_ref[...]

    # sublayer(x): linear layer on the MXU, f32 accumulation, no operand upcast.
    sub = jnp.dot(x, w_ref[...], preferred_element_type=jnp.float32)

    p = p_ref[...].astype(jnp.float32)
    bias = p[0:1, :]
    gamma = p[1:2, :]
    beta = p[2:3, :]

    # dropout: inference mode -> identity
    y = x.astype(jnp.float32) + sub + bias

    # LayerNormalization over d_model (unbiased std, eps added to std).
    d = y.shape[-1]
    mean = jnp.mean(y, axis=-1, keepdims=True)
    var = jnp.sum((y - mean) ** 2, axis=-1, keepdims=True) / (d - 1)
    std = jnp.sqrt(var)
    inv = pl.reciprocal(std + EPS, approx=True)          # (rt, 1) on the EUP
    out = gamma * (y - mean) * inv + beta

    o_ref[...] = out.astype(o_ref.dtype)


def _choose_row_tile(n_rows: int, requested: int) -> int:
    rt = max(8, (min(requested, n_rows) // 8) * 8)
    # Keep >= 2 grid steps so the "parallel" axis can shard across TensorCores.
    if n_rows // rt < 2 and n_rows >= 16:
        rt = max(8, (n_rows // 2 // 8) * 8)
    return rt


def residual_connection(x, w, b, gamma, beta, *, row_tile=256):
    """x: [B, S, D]; w: [D, D]; b, gamma, beta: [D]."""
    B, S, D = x.shape
    assert D > 1, "d_model must be > 1 (unbiased std divides by D-1)"
    R = B * S
    xf = x.reshape(R, D)

    rt = _choose_row_tile(R, row_tile)
    n_rows = pl.cdiv(R, rt) * rt
    if n_rows != R:
        xf = jnp.pad(xf, ((0, n_rows - R), (0, 0)))      # pad rows, sliced off below

    params = jnp.stack([b, gamma, beta], axis=0)         # (3, D): one DMA stream

    # VMEM budget: double-buffered x/out tiles + weight + params (cap for v7x).
    xb = rt * D * x.dtype.itemsize
    wb = D * D * w.dtype.itemsize
    pb = 3 * D * params.dtype.itemsize
    vmem_est = 2 * (2 * xb) + 2 * wb + 2 * pb
    vmem_limit = int(min(max(32 * 2**20, 2 * vmem_est), 64 * 2**20))

    cost = pl.CostEstimate(
        flops=2 * n_rows * D * D + 10 * n_rows * D,
        transcendentals=2 * n_rows,                      # sqrt + reciprocal per row
        bytes_accessed=2 * n_rows * D * x.dtype.itemsize + wb + pb,
    )

    # TODO(synk): for very large d_model where the DxD weight no longer fits
    # VMEM (esp. v7x, 64 MiB), K-tile the matmul with an f32 accumulator
    # scratch instead of keeping the full weight resident.
    out = pl.pallas_call(
        residual_ln_kernel,
        out_shape=jax.ShapeDtypeStruct((n_rows, D), x.dtype),
        grid_spec=pltpu.PrefetchScalarGridSpec(
            num_scalar_prefetch=0,
            grid=(n_rows // rt,),
            in_specs=[
                pl.BlockSpec((rt, D), lambda i: (i, 0)),   # x rows
                pl.BlockSpec((D, D), lambda i: (0, 0)),    # sublayer weight (native dtype)
                pl.BlockSpec((3, D), lambda i: (0, 0)),    # [bias; gamma; beta]
            ],
            out_specs=pl.BlockSpec((rt, D), lambda i: (i, 0)),
        ),
        compiler_params=pltpu.CompilerParams(
            dimension_semantics=("parallel",),
            vmem_limit_bytes=vmem_limit,
        ),
        cost_estimate=cost,
    )(xf, w, params)

    return out[:R].reshape(B, S, D)


def reference(x, w, b, gamma, beta):
    """Pure-JAX reference of LayerNorm(x + linear(x))."""
    xf = x.astype(jnp.float32)
    y = xf + (jnp.einsum("bsd,de->bse", xf, w.astype(jnp.float32)) + b)
    mean = jnp.mean(y, axis=-1, keepdims=True)
    var = jnp.sum((y - mean) ** 2, axis=-1, keepdims=True) / (y.shape[-1] - 1)
    std = jnp.sqrt(var)
    return gamma * (y - mean) / (std + EPS) + beta


if __name__ == "__main__":
    # Small but lane-dense shapes: batch=2, seq=64, d_model=128.
    B, S, D = 2, 64, 128

    key = jax.random.PRNGKey(0)
    kx, kw, kb = jax.random.split(key, 3)

    x = jax.random.normal(kx, (B, S, D), dtype=jnp.float32)
    # Deterministic sublayer (Linear) parameters.
    w = jax.random.normal(kw, (D, D), dtype=jnp.float32) * (1.0 / jnp.sqrt(D))
    b = jax.random.normal(kb, (D,), dtype=jnp.float32) * 0.02
    # LayerNormalization parameters: alpha=ones, bias=zeros (as in __init__).
    gamma = jnp.ones((D,), dtype=jnp.float32)
    beta = jnp.zeros((D,), dtype=jnp.float32)

    out = residual_connection(x, w, b, gamma, beta)
    out = jax.block_until_ready(out)

    ref = reference(x, w, b, gamma, beta)
    # approx reciprocal in the LN epilogue -> slightly looser tolerance.
    assert jnp.allclose(out, ref, atol=2e-2, rtol=2e-2), "mismatch vs reference"

    # TODO(synk): training-mode dropout (random mask + 1/(1-p) scale) omitted;
    # inference-mode identity is used, matching module.eval() semantics.
    print("KERNEL_OK")
</pallas_src>

<mosaic_0001>
module attributes {stable_mosaic.version = 11 : i64} {
  func.func @residual_ln_kernel(%arg0: i32, %arg1: memref<64x128xf32, #tpu.memory_space<vmem>>, %arg2: memref<128x128xf32, #tpu.memory_space<vmem>>, %arg3: memref<3x128xf32, #tpu.memory_space<vmem>>, %arg4: memref<64x128xf32, #tpu.memory_space<vmem>>) attributes {dimension_semantics = [#tpu.dimension_semantics<parallel>], iteration_bounds = array<i64: 2>, scalar_prefetch = 0 : i64, scratch_operands = 0 : i64, tpu.core_type = #tpu.core_type<tc>, window_params = [{transform_indices = @transform_0, window_bounds = array<i64: 64, 128>}, {pipeline_mode = #tpu.pipeline_mode<synchronous>, transform_indices = @transform_1, window_bounds = array<i64: 128, 128>}, {pipeline_mode = #tpu.pipeline_mode<synchronous>, transform_indices = @transform_2, window_bounds = array<i64: 3, 128>}, {transform_indices = @transform_3, window_bounds = array<i64: 64, 128>}]} {
    %c0 = arith.constant 0 : index
    %c0_0 = arith.constant 0 : index
    %0 = vector.load %arg1[%c0, %c0_0] : memref<64x128xf32, #tpu.memory_space<vmem>>, vector<64x128xf32>
    %c0_1 = arith.constant 0 : index
    %c0_2 = arith.constant 0 : index
    %1 = vector.load %arg2[%c0_1, %c0_2] : memref<128x128xf32, #tpu.memory_space<vmem>>, vector<128x128xf32>
    %cst = arith.constant dense<0.000000e+00> : vector<64x128xf32>
    %2 = tpu.matmul %0, %1, %cst {dimension_numbers = #tpu.dot_dimension_numbers<[1], [0], [0], [1], [0, 0, 1, 1], [], []>} : vector<64x128xf32>, vector<128x128xf32>, vector<64x128xf32> -> vector<64x128xf32>
    %c0_3 = arith.constant 0 : index
    %c0_4 = arith.constant 0 : index
    %3 = vector.load %arg3[%c0_3, %c0_4] : memref<3x128xf32, #tpu.memory_space<vmem>>, vector<3x128xf32>
    %4 = vector.extract_strided_slice %3 {offsets = [0, 0], sizes = [1, 128], strides = [1, 1]} : vector<3x128xf32> to vector<1x128xf32>
    %5 = vector.extract_strided_slice %3 {offsets = [1, 0], sizes = [1, 128], strides = [1, 1]} : vector<3x128xf32> to vector<1x128xf32>
    %6 = vector.extract_strided_slice %3 {offsets = [2, 0], sizes = [1, 128], strides = [1, 1]} : vector<3x128xf32> to vector<1x128xf32>
    %7 = arith.addf %0, %2 : vector<64x128xf32>
    %8 = vector.broadcast %4 : vector<1x128xf32> to vector<64x128xf32>
    %9 = arith.addf %7, %8 : vector<64x128xf32>
    %cst_5 = arith.constant dense<0.000000e+00> : vector<64xf32>
    %10 = vector.multi_reduction <add>, %9, %cst_5 [1] : vector<64x128xf32> to vector<64xf32>
    %11 = vector.shape_cast %10 : vector<64xf32> to vector<64x1xf32>
    %cst_6 = arith.constant 1.280000e+02 : f32
    %12 = vector.broadcast %cst_6 : f32 to vector<64x1xf32>
    %13 = arith.divf %11, %12 : vector<64x1xf32>
    %14 = vector.broadcast %13 : vector<64x1xf32> to vector<64x128xf32>
    %15 = arith.subf %9, %14 : vector<64x128xf32>
    %16 = arith.mulf %15, %15 : vector<64x128xf32>
    %cst_7 = arith.constant dense<0.000000e+00> : vector<64xf32>
    %17 = vector.multi_reduction <add>, %16, %cst_7 [1] : vector<64x128xf32> to vector<64xf32>
    %18 = vector.shape_cast %17 : vector<64xf32> to vector<64x1xf32>
    %cst_8 = arith.constant 1.270000e+02 : f32
    %19 = vector.broadcast %cst_8 : f32 to vector<64x1xf32>
    %20 = arith.divf %18, %19 : vector<64x1xf32>
    %21 = math.sqrt %20 : vector<64x1xf32>
    %cst_9 = arith.constant 9.99999997E-7 : f32
    %22 = vector.broadcast %cst_9 : f32 to vector<64x1xf32>
    %23 = arith.addf %21, %22 : vector<64x1xf32>
    %24 = tpu.reciprocal %23 {approx = true} : vector<64x1xf32> -> vector<64x1xf32>
    %25 = vector.broadcast %13 : vector<64x1xf32> to vector<64x128xf32>
    %26 = arith.subf %9, %25 : vector<64x128xf32>
    %27 = vector.broadcast %5 : vector<1x128xf32> to vector<64x128xf32>
    %28 = arith.mulf %27, %26 : vector<64x128xf32>
    %29 = vector.broadcast %24 : vector<64x1xf32> to vector<64x128xf32>
    %30 = arith.mulf %28, %29 : vector<64x128xf32>
    %31 = vector.broadcast %6 : vector<1x128xf32> to vector<64x128xf32>
    %32 = arith.addf %30, %31 : vector<64x128xf32>
    %c0_10 = arith.constant 0 : index
    %c0_11 = arith.constant 0 : index
    %33 = vector.load %arg4[%c0_10, %c0_11] : memref<64x128xf32, #tpu.memory_space<vmem>>, vector<64x128xf32>
    tpu.vector_store %arg4[%c0_10, %c0_11], %32 {strides = array<i32>} : memref<64x128xf32, #tpu.memory_space<vmem>>, vector<64x128xf32>,
    return
  }
  func.func @transform_0(%arg0: i32) -> (i32, i32) {
    %c0_i32 = arith.constant 0 : i32
    %c0_i32_0 = arith.constant 0 : i32
    return %arg0, %c0_i32 : i32, i32
  }
  func.func @transform_1(%arg0: i32) -> (i32, i32) {
    %c0_i32 = arith.constant 0 : i32
    %c0_i32_0 = arith.constant 0 : i32
    %c0_i32_1 = arith.constant 0 : i32
    return %c0_i32, %c0_i32_0 : i32, i32
  }
  func.func @transform_2(%arg0: i32) -> (i32, i32) {
    %c0_i32 = arith.constant 0 : i32
    %c0_i32_0 = arith.constant 0 : i32
    %c0_i32_1 = arith.constant 0 : i32
    return %c0_i32, %c0_i32_0 : i32, i32
  }
  func.func @transform_3(%arg0: i32) -> (i32, i32) {
    %c0_i32 = arith.constant 0 : i32
    %c0_i32_0 = arith.constant 0 : i32
    return %arg0, %c0_i32 : i32, i32
  }
}

</mosaic_0001>

<bundles_post_ra>
// kernel: tpu_custom_call.1
= control target key start
LH: loop header
LB: loop body
LE: loop exit
PB: predicated region body
PF: predicated region fallthrough
CT: control target
= control target key end

     0   :  { %8 = vsyncpa [#allocation3], 0  ;;  %s1326_s0 = inlined_call_operand.hbm [shape: f32[128,128], index: 0, kind: input, shape index: {}]   ;;  %s1327_s1 = inlined_call_operand.hbm [shape: f32[128,128], index: 1, kind: input, shape index: {}]   ;;  %s1328_s2 = inlined_call_operand.vmem [shape: f32[3,128], index: 2, kind: input, shape index: {}]   ;;  %s1329_s3 = inlined_call_operand.hbm [shape: f32[128,128], index: 3, kind: output, shape index: {}]  }
   0x1   :  { %10 = vsyncpa [#allocation3 + $0x1], 0 }
   0x2   :  { %11 = vsyncpa [#allocation6], 0 }
   0x3   :  { %12 = vsyncpa [#allocation4], 0 }
   0x4   :  { %14 = vsyncpa [#allocation4 + $0x1], 0  ;;  %s1015_s12 = smov 0   ;;  %s1017_s13 = smov 0  }
   0x5   :  { %s1019_s14 = smov 0   ;;  %s1021_s15 = smov 0  }
   0x6 LB: > { %s1036_s16 = sadd.s32 4294967295, %s986_s15   ;;  %s631_s17 = sadd.s32 4294967294, %s986_s15   ;;  %s986_s15 = sphi %s1021_s15, %s1349_s15   ;;  %s982_s14 = sphi %s1019_s14, %s1348_s14   ;;  %s978_s13 = sphi %s1017_s13, %s1347_s13   ;;  %s974_s12 = sphi %s1015_s12, %s1346_s12  }
   0x7   : > { %p40_p0 = scmp.ne.s32.totalorder %s978_s13, %s974_s12  ;;  %p1330_p1 = scmp.eq.s32.totalorder %s1036_s16, 0 }
   0x8   : > { %p112_p3 = scmp.eq.s32.totalorder %s631_s17, 1  ;;  %p632_p5 = scmp.ge.s32.totalorder %s986_s15, 1 }
   0x9   : > { %p1045_p4 = por %p1330_p1, %p40_p0  ;;  %p119_p7 = scmp.lt.s32.totalorder %s986_s15, 3 }
   0xa   : > { %p1050_p6 = por %p112_p3, %p40_p0  ;;  %s988_s21 = smov [#allocation5]  }
   0xb   : > { %s1333_s18 = scalar_select %p1045_p4, 1, 0 }
   0xc   : > { %s1334_s19 = scalar_select %p1050_p6, 1, 0 }
   0xd   : > { %p1055_p8 = pnand %p632_p5, %p119_p7  ;;  %s131_s22 = sshll.u32 %s988_s21, 4  ;;  %s1059_s22 = int_to_ptr.vmem [resolvable:$true] %s131_s22 }
   0xe   : > { %s1071_s24 = sadd.s32 1, %s986_s15   ;;  %s27_s25 = sadd.s32 1, %s982_s14 }
   0xf   : > { %s1335_s20 = scalar_select %p1055_p8, 1, 0 }
  0x10   : > { %p773_p9 = pneg %p1055_p8  ;;  %s24_s26 = ssub.s32 %s986_s15, %s1071_s24 }
  0x11   : > { %s858_s29 = scalar_lea.hbm %s1327_s1, 2048 }
  0x12   : > { %p1066_p11 = pnand %p773_p9, %p1330_p1  ;;  %p859_p12 = scmp.ne.s32.totalorder %s1327_s1, %s858_s29 }
  0x13   : > { %p865_p5 = scmp.lt.u32.totalorder %s858_s29, %s1327_s1 }
  0x14   : > { %p860_p13 = pneg %p1066_p11 }
  0x16   : > { %p861_p0 = pnand %p860_p13, %p859_p12 }
  0x18   : > { %p862_p3 = pneg %p861_p0 }
  0x1a   : > { %p867_p7 = pnand %p865_p5, %p862_p3 }
  0x1c   : > { %870 = shalt.err (!%p867_p7)
}
  0x1d   : > { %s871_s7 = scalar_lea.vmem %s1059_s22, 2048  ;;  %p879_p2 = scmp.lt.s32.totalorder %s1059_s22, %s1059_s22 }
  0x1e   : > { %p872_p9 = scmp.ne.s32.totalorder %s1059_s22, %s871_s7  ;;  %p880_p6 = scmp.lt.s32.totalorder %s871_s7, %s871_s7 }
  0x20   : > { %p874_p10 = pnand %p872_p9, %p860_p13  ;;  %p881_p4 = por %p880_p6, %p879_p2 }
  0x22   : > { %p875_p1 = pneg %p874_p10 }
  0x24   : > { %p882_p8 = pnand %p881_p4, %p875_p1 }
  0x26   : > { %885 = shalt.err (!%p882_p8)
}
  0x27   : > { %s989_s8 = smov 128   ;;  %s990_s9 = smov 8  }
  0x28   : > { %776 = dma.hbm_to_vmem [thread:$0]  (!%p1066_p11), %s1327_s1, 2048, %s1059_s22, [#allocation6], %s989_s8, %s989_s8, %s990_s9  }
  0x29   : > { %p25_p1 = scmp.eq.s32.totalorder %s24_s26, 0  ;;  %p34_p2 = scmp.ne.s32.totalorder %s982_s14, %s978_s13 }
  0x2a   : > { %p35_p4 = scmp.eq.s32.totalorder %s986_s15, 0  ;;  %p786_p6 = scmp.lt.s32.totalorder %s986_s15, 2 }
  0x2b   : > { %s1105_s17 = scalar_select %p25_p1, %s982_s14, %s27_s25  }
  0x2c   : > { %p36_p8 = por %p35_p4, %p34_p2  ;;  %p1337_p10 = scmp.eq.s32.totalorder %s1036_s16, 1 }
  0x2d   : > { %s148_s23 = sand.u32 1, %s982_s14   ;;  %s647_s27 = sshll.u32 %s986_s15, 10 }
  0x2e   : > { %p1109_p12 = por %p1337_p10, %p34_p2  ;;  %s635_s28 = sshll.u32 %s148_s23, 6 }
  0x2f   : > { %s1118_s4 = scalar_lea.hbm %s1326_s0, %s647_s27  ;;  %s152_s22 = scalar_lea.vmem [#allocation2], %s635_s28 }
  0x30   : > { %s159_s25 = sshll.u32 %s152_s22, 4  ;;  %p1120_p11 = pnand %p786_p6, %p36_p8  ;;  %s1124_s25 = int_to_ptr.vmem [resolvable:$true] %s159_s25 }
  0x31   : > { %s1126_s5 = scalar_lea.sflag [#allocation3], %s148_s23  ;;  %s886_s6 = scalar_lea.hbm %s1118_s4, 1024 }
  0x32   : > { %p887_p13 = scmp.ne.s32.totalorder %s1118_s4, %s886_s6  ;;  %p888_p0 = pneg %p1120_p11 }
  0x33   : > { %s891_s11 = scalar_lea.hbm %s1326_s0, 2048  ;;  %p892_p7 = scmp.lt.u32.totalorder %s1118_s4, %s1326_s0 }
  0x34   : > { %p889_p3 = pnand %p888_p0, %p887_p13  ;;  %p893_p9 = scmp.lt.u32.totalorder %s891_s11, %s886_s6 }
  0x35   : > { %p895_p2 = scmp.lt.u32.totalorder %s886_s6, %s1118_s4 }
  0x36   : > { %p890_p5 = pneg %p889_p3  ;;  %p894_p1 = por %p893_p9, %p892_p7 }
  0x38   : > { %p896_p4 = por %p895_p2, %p894_p1 }
  0x3a   : > { %p897_p6 = pnand %p896_p4, %p890_p5 }
  0x3c   : > { %900 = shalt.err (!%p897_p6)
}
  0x3d   : > { %s901_s23 = scalar_lea.vmem %s1124_s25, 1024  ;;  %s991_s29 = smov [#allocation2]  }
  0x3e   : > { %p902_p8 = scmp.ne.s32.totalorder %s1124_s25, %s901_s23  ;;  %s906_s30 = sshll.u32 %s991_s29, 4  ;;  %s907_s30 = int_to_ptr.vmem [resolvable:$false] %s906_s30 }
  0x3f   : > { %s908_s22 = scalar_lea.vmem %s907_s30, 2048  ;;  %p909_p3 = scmp.lt.s32.totalorder %s1124_s25, %s907_s30 }
  0x40   : > { %p904_p10 = pnand %p902_p8, %p888_p0  ;;  %p910_p7 = scmp.lt.s32.totalorder %s908_s22, %s901_s23 }
  0x42   : > { %p905_p13 = pneg %p904_p10  ;;  %p911_p9 = por %p910_p7, %p909_p3 }
  0x44   : > { %p912_p1 = pnand %p911_p9, %p905_p13 }
  0x46   : > { %915 = shalt.err (!%p912_p1)
}
  0x47   : > { %780 = dma.hbm_to_vmem [thread:$0]  (!%p1120_p11), %s1118_s4, 1024, %s1124_s25, %s1126_s5, %s989_s8, %s989_s8, %s990_s9  }
  0x48   : > { %p1340_p0 = scmp.ne.s32.totalorder %s1335_s20, 0 }
  0x49   : > { %s1160_s6 = sand.u32 (!%p1340_p0), 1, %s978_s13   ;;  %p1341_p5 = scmp.ne.s32.totalorder (!%p1340_p0), %s1333_s18, 0 }
  0x4a   : > { %171 = sbr.rel (%p1340_p0) target bundleno = 692 (0x2b4), region = 32  ;;  %s639_s7 = sshll.u32 (!%p1340_p0), %s1160_s6, 6 }
  0x4b   : > { %s174_s10 = scalar_lea.sflag (!%p1340_p0), [#allocation3], %s1160_s6  ;;  %s1166_s26 = scalar_lea.vmem (!%p1340_p0), [#allocation2], %s639_s7 }
  0x51   : > { %961 = dma.done.wait (%p1341_p5), %s174_s10, 1024  }
  0x52   : > { %963 = vsyncadd (%p1341_p5), %s174_s10, 4294966272  ;;  %p1342_p11 = scmp.eq.s32.totalorder %s1036_s16, 0 }
  0x54   : > { %965 = dma.done.wait (%p1342_p11), [#allocation6], 2048   ;;  %p1343_p2 = pmov %p1342_p11 }
  0x55   : > { %v214_v0 = vld [vmem:[#allocation5] sm:$0xff]  ;;  %v215_v1 = vld [vmem:[#allocation5 + $0x8] sm:$0xff]  ;;  %v216_v2 = vld [vmem:[#allocation5 + $0x10] sm:$0xff]  ;;  %v344_v32 = vlaneseq  ;;  %s1251_s8 = scalar_lea.vmem [#allocation7], %s639_s7  ;;  %s648_s9 = sshll.u32 %s1036_s16, 10 }
  0x56   : > { %967 = vsyncadd (%p1343_p2), [#allocation6], 4294965248  ;;  %v717_v3 = vpack.c.bf16 %v215_v1, %v214_v0  ;;  %v217_v4 = vld [vmem:[#allocation5 + $0x18] sm:$0xff]  ;;  %v218_v6 = vld [vmem:[#allocation5 + $0x20] sm:$0xff]  ;;  %s548_s4 = sshll.u32 %s1251_s8, 4  ;;  %s1278_s11 = scalar_lea.hbm %s1329_s3, %s648_s9  ;;  %s1280_s4 = int_to_ptr.vmem [resolvable:$true] %s548_s4 }
  0x57   : > { %v721_v5 = vpack.c.bf16 %v217_v4, %v216_v2  ;;  %v219_v7 = vld [vmem:[#allocation5 + $0x28] sm:$0xff]  ;;  %v1177_v9 = vld [vmem:[%s1166_s26] sm:$0xff]  ;;  %v220_v11 = vld [vmem:[#allocation5 + $0x30] sm:$0xff]  ;;  %v345_v33 = vshrl.u32 %v344_v32, 7  ;;  %s535_s16 = scalar_lea.sflag [#allocation4], %s1160_s6  ;;  %s916_s27 = scalar_lea.vmem %s1280_s4, 1024 }
  0x58   : > { %718 = vmatprep.subr.bf16.mxu0 %v717_v3  ;;  %749 = vmatprep.subr.bf16.mxu1 %v717_v3  ;;  %v725_v8 = vpack.c.bf16 %v219_v7, %v218_v6  ;;  %v1180_v10 = vld [vmem:[%s1166_s26 + $0x20] sm:$0xff]  ;;  %v221_v12 = vld [vmem:[#allocation5 + $0x38] sm:$0xff]  ;;  %v223_v15 = vld [vmem:[#allocation5 + $0x48] sm:$0xff]  ;;  %p917_p4 = scmp.ne.s32.totalorder %s1280_s4, %s916_s27  ;;  %s992_s28 = smov [#allocation7]  }
  0x59   : > { %720 = vmatpush3.bf16.msra.mxu0 %v717_v3  ;;  %757 = vmatpush3.bf16.msra.mxu1 %v717_v3  ;;  %v729_v13 = vpack.c.bf16 %v221_v12, %v220_v11  ;;  %v222_v14 = vld [vmem:[#allocation5 + $0x40] sm:$0xff]  ;;  %v224_v17 = vld [vmem:[#allocation5 + $0x50] sm:$0xff]  ;;  %v225_v18 = vld [vmem:[#allocation5 + $0x58] sm:$0xff]  ;;  %v516_v34 = vsub.s32 2, %v345_v33  ;;  %v496_v37 = vsub.s32 1, %v345_v33  ;;  %v346_v39 = vsub.s32 0, %v345_v33 }
  0x5a   : > { %722 = vmatprep.subr.bf16.mxu0 %v721_v5  ;;  %750 = vmatprep.subr.bf16.mxu1 %v721_v5  ;;  %v733_v16 = vpack.c.bf16 %v223_v15, %v222_v14  ;;  %v737_v19 = vpack.c.bf16 %v225_v18, %v224_v17  ;;  %v226_v20 = vld [vmem:[#allocation5 + $0x60] sm:$0xff]  ;;  %v227_v21 = vld [vmem:[#allocation5 + $0x68] sm:$0xff]  ;;  %v228_v23 = vld [vmem:[#allocation5 + $0x70] sm:$0xff]  ;;  %p918_p6 = pnand %p917_p4, %p1109_p12  ;;  %s920_s23 = sshll.u32 %s992_s28, 4  ;;  %s921_s23 = int_to_ptr.vmem [resolvable:$false] %s920_s23 }
  0x5b   : > { %705 = vmatprep.mubr.f32.mxu0 %v1177_v9  ;;  %711 = vmatprep.mubr.f32.mxu1 %v1180_v10  ;;  %v741_v22 = vpack.c.bf16 %v227_v21, %v226_v20  ;;  %v229_v24 = vld [vmem:[#allocation5 + $0x78] sm:$0xff]  ;;  %v207_v26 = vld [vmem:[%s1166_s26 + $0x8] sm:$0xff]  ;;  %v208_v28 = vld [vmem:[%s1166_s26 + $0x10] sm:$0xff]  ;;  %s922_s29 = scalar_lea.vmem %s921_s23, 2048  ;;  %p923_p10 = scmp.lt.s32.totalorder %s1280_s4, %s921_s23 }
  0x5c   : > { %v745_v25 = vpack.c.bf16 %v229_v24, %v228_v23  ;;  %v211_v27 = vld [vmem:[%s1166_s26 + $0x28] sm:$0xff]  ;;  %v212_v29 = vld [vmem:[%s1166_s26 + $0x30] sm:$0xff]  ;;  %v209_v30 = vld [vmem:[%s1166_s26 + $0x18] sm:$0xff]  ;;  %p919_p8 = pneg %p918_p6  ;;  %p924_p13 = scmp.lt.s32.totalorder %s922_s29, %s916_s27 }
  0x5d   : > { %724 = vmatpush3.bf16.msra.mxu0 %v721_v5  ;;  %758 = vmatpush3.bf16.msra.mxu1 %v721_v5  ;;  %v213_v31 = vld [vmem:[%s1166_s26 + $0x38] sm:$0xff]  ;;  %v335_v35 = vld [vmem:[%s1328_s2] sm:$0x7] }
  0x5e   : > { %726 = vmatprep.subr.bf16.mxu0 %v725_v8  ;;  %751 = vmatprep.subr.bf16.mxu1 %v725_v8  ;;  %v1193_v36 = vrot.slane %v335_v35, %v516_v34  ;;  %v1195_v38 = vrot.slane %v335_v35, %v496_v37  ;;  %v347_v40 = vrot.slane %v335_v35, %v346_v39  ;;  %p925_p3 = por %p924_p13, %p923_p10 }
  0x60   : > { %p926_p7 = pnand %p925_p3, %p919_p8 }
  0x61   : > { %728 = vmatpush3.bf16.msra.mxu0 %v725_v8  ;;  %759 = vmatpush3.bf16.msra.mxu1 %v725_v8 }
  0x62   : > { %730 = vmatprep.subr.bf16.mxu0 %v729_v13  ;;  %752 = vmatprep.subr.bf16.mxu1 %v729_v13 }
  0x65   : > { %732 = vmatpush3.bf16.msra.mxu0 %v729_v13  ;;  %760 = vmatpush3.bf16.msra.mxu1 %v729_v13 }
  0x66   : > { %734 = vmatprep.subr.bf16.mxu0 %v733_v16  ;;  %753 = vmatprep.subr.bf16.mxu1 %v733_v16 }
  0x69   : > { %736 = vmatpush3.bf16.msra.mxu0 %v733_v16  ;;  %761 = vmatpush3.bf16.msra.mxu1 %v733_v16 }
  0x6a   : > { %738 = vmatprep.subr.bf16.mxu0 %v737_v19  ;;  %754 = vmatprep.subr.bf16.mxu1 %v737_v19 }
  0x6d   : > { %740 = vmatpush3.bf16.msra.mxu0 %v737_v19  ;;  %762 = vmatpush3.bf16.msra.mxu1 %v737_v19 }
  0x6e   : > { %742 = vmatprep.subr.bf16.mxu0 %v741_v22  ;;  %755 = vmatprep.subr.bf16.mxu1 %v741_v22 }
  0x71   : > { %744 = vmatpush3.bf16.msra.mxu0 %v741_v22  ;;  %763 = vmatpush3.bf16.msra.mxu1 %v741_v22 }
  0x72   : > { %746 = vmatprep.subr.bf16.mxu0 %v745_v25  ;;  %756 = vmatprep.subr.bf16.mxu1 %v745_v25 }
  0x75   : > { %748 = vmatpush3.bf16.msra.mxu0 %v745_v25  ;;  %764 = vmatpush3.bf16.msra.mxu1 %v745_v25 }
  0x78   : > { %706 = vmatmul.mubr.f32.vlgmr.msra.gmra.mrb[0].mxu0 %v207_v26  ;;  %712 = vmatmul.mubr.f32.vlgmr.msra.gmra.mrb[0].mxu1 %v211_v27 }
  0x79   : > { %708 = vmatprep.mubr.f32.mxu0 %v208_v28  ;;  %714 = vmatprep.mubr.f32.mxu1 %v212_v29 }
  0x7c   : > { %709 = vmatmul.mubr.f32.gmra.mrb[2].mxu0 %v209_v30  ;;  %715 = vmatmul.mubr.f32.gmra.mrb[2].mxu1 %v213_v31 }
 0x14b   : > { %v707_v41 = vpop.f32.mrb[0].mxu0  ;;  %v713_v42 = vpop.f32.mrb[0].mxu1 }
 0x14c   : > { %v337_v43 = vadd.f32 %v707_v41, %v207_v26  ;;  %v341_v44 = vadd.f32 %v713_v42, %v211_v27  ;;  %v296_v45 = vpop.f32.mrb[1].mxu0  ;;  %v316_v46 = vpop.f32.mrb[1].mxu1 }
 0x14d   : > { %v336_v47 = vadd.f32 %v296_v45, %v1177_v9  ;;  %v340_v56 = vadd.f32 %v316_v46, %v1180_v10 }
 0x14e   : > { %v353_v48 = vadd.f32 %v347_v40, %v341_v44  ;;  %v349_v49 = vadd.f32 %v347_v40, %v337_v43 }
 0x14f   : > { %v710_v50 = vpop.f32.mrb[2].mxu0  ;;  %v716_v51 = vpop.f32.mrb[2].mxu1  ;;  %v348_v57 = vadd.f32 %v347_v40, %v336_v47  ;;  %v352_v62 = vadd.f32 %v347_v40, %v340_v56 }
 0x150   : > { %v339_v52 = vadd.f32 %v710_v50, %v209_v30  ;;  %366 = vadd.xlane.f32.xlu1 %v353_v48  ;;  %358 = vadd.xlane.f32.xlu0 %v349_v49  ;;  %v306_v53 = vpop.f32.mrb[3].mxu0  ;;  %v326_v54 = vpop.f32.mrb[3].mxu1  ;;  %v343_v59 = vadd.f32 %v716_v51, %v213_v31 }
 0x151   : > { %v338_v55 = vadd.f32 %v306_v53, %v208_v28  ;;  %v342_v60 = vadd.f32 %v326_v54, %v212_v29 }
 0x152   : > { %v351_v58 = vadd.f32 %v347_v40, %v339_v52  ;;  %v355_v0 = vadd.f32 %v347_v40, %v343_v59 }
 0x153   : > { %v350_v61 = vadd.f32 %v347_v40, %v338_v55  ;;  %v354_v63 = vadd.f32 %v347_v40, %v342_v60 }
 0x154   : > { %356 = vadd.xlane.f32.xlu0 %v348_v57  ;;  %362 = vadd.xlane.f32.xlu1 %v351_v58 }
 0x158   : > { %364 = vadd.xlane.f32.xlu0 %v352_v62  ;;  %360 = vadd.xlane.f32.xlu1 %v350_v61 }
 0x15c   : > { %368 = vadd.xlane.f32.xlu0 %v354_v63  ;;  %370 = vadd.xlane.f32.xlu1 %v355_v0 }
 0x1dd   : > { %v367_v1 = vpop.xlane.xlu1 %366  ;;  %v359_v2 = vpop.xlane.xlu0 %358 }
 0x1de   : > { %v378_v3 = vmul.f32 0.0078125, %v367_v1  ;;  %v374_v4 = vmul.f32 0.0078125, %v359_v2 }
 0x1e0   : > { %v386_v5 = vsub.f32 %v353_v48, %v378_v3  ;;  %v382_v6 = vsub.f32 %v349_v49, %v374_v4 }
 0x1e1   : > { %v357_v7 = vpop.xlane.xlu0 %356  ;;  %v363_v8 = vpop.xlane.xlu1 %362 }
 0x1e2   : > { %v1200_v9 = vmul.f32 %v1195_v38, %v386_v5  ;;  %v1203_v10 = vmul.f32 %v1195_v38, %v382_v6  ;;  %v373_v11 = vmul.f32 0.0078125, %v357_v7  ;;  %v376_v12 = vmul.f32 0.0078125, %v363_v8 }
 0x1e3   : > { %v390_v13 = vmul.f32 %v382_v6, %v382_v6  ;;  %v394_v23 = vmul.f32 %v386_v5, %v386_v5 }
 0x1e4   : > { %v381_v14 = vsub.f32 %v348_v57, %v373_v11  ;;  %v384_v15 = vsub.f32 %v351_v58, %v376_v12 }
 0x1e5   : > { %399 = vadd.xlane.f32.xlu1 %v390_v13  ;;  %v365_v16 = vpop.xlane.xlu0 %364  ;;  %v361_v17 = vpop.xlane.xlu1 %360 }
 0x1e6   : > { %v1206_v18 = vmul.f32 %v1195_v38, %v381_v14  ;;  %v1209_v19 = vmul.f32 %v1195_v38, %v384_v15  ;;  %v377_v20 = vmul.f32 0.0078125, %v365_v16  ;;  %v375_v21 = vmul.f32 0.0078125, %v361_v17 }
 0x1e7   : > { %v389_v22 = vmul.f32 %v381_v14, %v381_v14  ;;  %v392_v33 = vmul.f32 %v384_v15, %v384_v15 }
 0x1e8   : > { %v385_v24 = vsub.f32 %v352_v62, %v377_v20  ;;  %v383_v25 = vsub.f32 %v350_v61, %v375_v21 }
 0x1e9   : > { %397 = vadd.xlane.f32.xlu0 %v389_v22  ;;  %407 = vadd.xlane.f32.xlu1 %v394_v23  ;;  %v369_v26 = vpop.xlane.xlu0 %368  ;;  %v371_v27 = vpop.xlane.xlu1 %370 }
 0x1ea   : > { %v1212_v28 = vmul.f32 %v1195_v38, %v385_v24  ;;  %v1215_v29 = vmul.f32 %v1195_v38, %v383_v25  ;;  %v379_v30 = vmul.f32 0.0078125, %v369_v26  ;;  %v380_v31 = vmul.f32 0.0078125, %v371_v27 }
 0x1eb   : > { %v393_v32 = vmul.f32 %v385_v24, %v385_v24  ;;  %v391_v41 = vmul.f32 %v383_v25, %v383_v25 }
 0x1ec   : > { %v387_v34 = vsub.f32 %v354_v63, %v379_v30  ;;  %v388_v35 = vsub.f32 %v355_v0, %v380_v31 }
 0x1ed   : > { %405 = vadd.xlane.f32.xlu0 %v393_v32  ;;  %403 = vadd.xlane.f32.xlu1 %v392_v33 }
 0x1ee   : > { %v1218_v37 = vmul.f32 %v1195_v38, %v387_v34  ;;  %v1221_v39 = vmul.f32 %v1195_v38, %v388_v35  ;;  %v396_v40 = vmul.f32 %v388_v35, %v388_v35  ;;  %v395_v42 = vmul.f32 %v387_v34, %v387_v34 }
 0x1f1   : > { %401 = vadd.xlane.f32.xlu0 %v391_v41  ;;  %411 = vadd.xlane.f32.xlu1 %v396_v40 }
 0x1f5   : > { %409 = vadd.xlane.f32.xlu0 %v395_v42 }
 0x272   : > { %v400_v43 = vpop.xlane.xlu1 %399 }
 0x273   : > { %v415_v44 = vmul.f32 0.007874016, %v400_v43 }
 0x275   : > { %826 = vrsqrt.f32 %v415_v44  ;;  %vm431_vm0 = vcmp.eq.f32.partialorder %v415_v44, inf  ;;  %v434_v58 = vand.u32 2147483648, %v415_v44  ;;  %vm433_vm1 = vcmp.eq.f32.partialorder %v415_v44, 0.0 }
 0x276   : > { %v398_v45 = vpop.xlane.xlu0 %397  ;;  %v408_v46 = vpop.xlane.xlu1 %407 }
 0x277   : > { %v414_v47 = vmul.f32 0.007874016, %v398_v45  ;;  %v419_v48 = vmul.f32 0.007874016, %v408_v46 }
 0x279   : > { %828 = vrsqrt.f32 %v414_v47  ;;  %vm424_vm2 = vcmp.eq.f32.partialorder %v414_v47, inf  ;;  %vm426_vm3 = vcmp.eq.f32.partialorder %v414_v47, 0.0  ;;  %v427_v3 = vand.u32 2147483648, %v414_v47 }
 0x27a   : > { %830 = vrsqrt.f32 %v419_v48  ;;  %v406_v49 = vpop.xlane.xlu0 %405  ;;  %v404_v50 = vpop.xlane.xlu1 %403  ;;  %vm459_vm4 = vcmp.eq.f32.partialorder %v419_v48, inf  ;;  %v462_v6 = vand.u32 2147483648, %v419_v48  ;;  %vm461_vm5 = vcmp.eq.f32.partialorder %v419_v48, 0.0 }
 0x27b   : > { %v418_v51 = vmul.f32 0.007874016, %v406_v49  ;;  %v417_v38 = vmul.f32 0.007874016, %v404_v50 }
 0x27d   : > { %832 = vrsqrt.f32 %v418_v51  ;;  %vm452_vm6 = vcmp.eq.f32.partialorder %v418_v51, inf  ;;  %vm454_vm7 = vcmp.eq.f32.partialorder %v418_v51, 0.0  ;;  %v455_v17 = vand.u32 2147483648, %v418_v51 }
 0x27e   : > { %834 = vrsqrt.f32 %v417_v38  ;;  %v402_v52 = vpop.xlane.xlu0 %401  ;;  %v412_v53 = vpop.xlane.xlu1 %411  ;;  %vm445_vm8 = vcmp.eq.f32.partialorder %v417_v38, inf  ;;  %v448_v22 = vand.u32 2147483648, %v417_v38  ;;  %vm447_vm9 = vcmp.eq.f32.partialorder %v417_v38, 0.0 }
 0x27f   : > { %v827_v54 = vpop.eup %826  ;;  %v1223_v55 = vmul.f32 0.007874016, %v402_v52  ;;  %v1225_v56 = vmul.f32 0.007874016, %v412_v53 }
 0x280   : > { %v430_v57 = vmul.f32 %v827_v54, %v415_v44 }
 0x281   : > { %836 = vrsqrt.f32 %v1223_v55  ;;  %vm438_vm10 = vcmp.eq.f32.partialorder %v1223_v55, inf  ;;  %vm440_vm11 = vcmp.eq.f32.partialorder %v1223_v55, 0.0  ;;  %v441_v33 = vand.u32 2147483648, %v1223_v55 }
 0x282   : > { %v432_v59 = vsel %vm431_vm0, %v415_v44, %v430_v57  ;;  %838 = vrsqrt.f32 %v1225_v56  ;;  %v410_v60 = vpop.xlane.xlu0 %409  ;;  %vm473_vm12 = vcmp.eq.f32.partialorder %v1225_v56, inf  ;;  %v476_v40 = vand.u32 2147483648, %v1225_v56 }
 0x283   : > { %v829_v61 = vpop.eup %828  ;;  %v435_v62 = vsel %vm433_vm1, %v434_v58, %v432_v59  ;;  %v1229_v63 = vmul.f32 0.007874016, %v410_v60  ;;  %vm475_vm13 = vcmp.eq.f32.partialorder %v1225_v56, 0.0 }
 0x284   : > { %v831_v0 = vpop.eup %830  ;;  %v479_v1 = vadd.f32 1e-06, %v435_v62  ;;  %v423_v2 = vmul.f32 %v829_v61, %v414_v47 }
 0x285   : > { %v458_v4 = vmul.f32 %v831_v0, %v419_v48  ;;  %840 = vrsqrt.f32 %v1229_v63  ;;  %vm466_vm14 = vcmp.eq.f32.partialorder %v1229_v63, inf  ;;  %v469_v50 = vand.u32 2147483648, %v1229_v63 }
 0x286   : > { %842 = vrcp.f32 %v479_v1  ;;  %v425_v5 = vsel %vm424_vm2, %v414_v47, %v423_v2  ;;  %vm468_vm15 = vcmp.eq.f32.partialorder %v1229_v63, 0.0 }
 0x287   : > { %v833_v7 = vpop.eup %832  ;;  %v428_v8 = vsel %vm426_vm3, %v427_v3, %v425_v5  ;;  %v460_v11 = vsel %vm459_vm4, %v419_v48, %v458_v4 }
 0x288   : > { %v835_v12 = vpop.eup %834  ;;  %v478_v13 = vadd.f32 1e-06, %v428_v8  ;;  %v463_v14 = vsel %vm461_vm5, %v462_v6, %v460_v11  ;;  %v451_v15 = vmul.f32 %v833_v7, %v418_v51 }
 0x289   : > { %v483_v16 = vadd.f32 1e-06, %v463_v14  ;;  %v444_v20 = vmul.f32 %v835_v12, %v417_v38 }
 0x28a   : > { %844 = vrcp.f32 %v478_v13  ;;  %v453_v21 = vsel %vm452_vm6, %v418_v51, %v451_v15 }
 0x28b   : > { %v837_v23 = vpop.eup %836  ;;  %846 = vrcp.f32 %v483_v16  ;;  %v456_v24 = vsel %vm454_vm7, %v455_v17, %v453_v21  ;;  %v446_v25 = vsel %vm445_vm8, %v417_v38, %v444_v20 }
 0x28c   : > { %v839_v26 = vpop.eup %838  ;;  %v482_v27 = vadd.f32 1e-06, %v456_v24  ;;  %v449_v30 = vsel %vm447_vm9, %v448_v22, %v446_v25  ;;  %v437_v31 = vmul.f32 %v837_v23, %v1223_v55 }
 0x28d   : > { %v481_v32 = vadd.f32 1e-06, %v449_v30  ;;  %v472_v34 = vmul.f32 %v839_v26, %v1225_v56 }
 0x28e   : > { %848 = vrcp.f32 %v482_v27  ;;  %v439_v35 = vsel %vm438_vm10, %v1223_v55, %v437_v31 }
 0x28f   : > { %v841_v41 = vpop.eup %840  ;;  %850 = vrcp.f32 %v481_v32  ;;  %v442_v42 = vsel %vm440_vm11, %v441_v33, %v439_v35  ;;  %v474_v43 = vsel %vm473_vm12, %v1225_v56, %v472_v34 }
 0x290   : > { %v843_v44 = vpop.eup %842  ;;  %v480_v45 = vadd.f32 1e-06, %v442_v42  ;;  %v477_v46 = vsel %vm475_vm13, %v476_v40, %v474_v43  ;;  %v465_v47 = vmul.f32 %v841_v41, %v1229_v63 }
 0x291   : > { %v507_v48 = vmul.f32 %v843_v44, %v1203_v10  ;;  %v485_v49 = vadd.f32 1e-06, %v477_v46 }
 0x292   : > { %852 = vrcp.f32 %v480_v45  ;;  %v467_v51 = vsel %vm466_vm14, %v1229_v63, %v465_v47 }
 0x293   : > { %v519_v38 = vadd.f32 %v1193_v36, %v507_v48  ;;  %854 = vrcp.f32 %v485_v49  ;;  %v470_v52 = vsel %vm468_vm15, %v469_v50, %v467_v51 }
 0x294   : > { %v845_v53 = vpop.eup %844  ;;  %v484_v54 = vadd.f32 1e-06, %v470_v52 }
 0x295   : > { %v847_v55 = vpop.eup %846  ;;  %527 = vst [vmem:[%s1251_s8 + $0x8] sm:$0xff] %v519_v38  ;;  %v506_v10 = vmul.f32 %v845_v53, %v1206_v18 }
 0x296   : > { %v511_v56 = vmul.f32 %v847_v55, %v1200_v9  ;;  %856 = vrcp.f32 %v484_v54 }
 0x297   : > { %v518_v57 = vadd.f32 %v1193_v36, %v506_v10 }
 0x298   : > { %v849_v58 = vpop.eup %848  ;;  %v523_v59 = vadd.f32 %v1193_v36, %v511_v56 }
 0x299   : > { %v851_v60 = vpop.eup %850  ;;  %526 = vst [vmem:[%s1251_s8] sm:$0xff] %v518_v57  ;;  %v510_v61 = vmul.f32 %v849_v58, %v1212_v28 }
 0x29a   : > { %531 = vst [vmem:[%s1251_s8 + $0x28] sm:$0xff] %v523_v59  ;;  %v509_v62 = vmul.f32 %v851_v60, %v1209_v19 }
 0x29b   : > { %v522_v9 = vadd.f32 %v1193_v36, %v510_v61 }
 0x29c   : > { %v853_v18 = vpop.eup %852  ;;  %v521_v63 = vadd.f32 %v1193_v36, %v509_v62 }
 0x29d   : > { %v855_v0 = vpop.eup %854  ;;  %530 = vst [vmem:[%s1251_s8 + $0x20] sm:$0xff] %v522_v9  ;;  %v508_v1 = vmul.f32 %v853_v18, %v1215_v29 }
 0x29e   : > { %529 = vst [vmem:[%s1251_s8 + $0x18] sm:$0xff] %v521_v63  ;;  %v513_v2 = vmul.f32 %v855_v0, %v1221_v39 }
 0x29f   : > { %v520_v28 = vadd.f32 %v1193_v36, %v508_v1 }
 0x2a0   : > { %v857_v19 = vpop.eup %856  ;;  %v525_v3 = vadd.f32 %v1193_v36, %v513_v2 }
 0x2a1   : > { %528 = vst [vmem:[%s1251_s8 + $0x10] sm:$0xff] %v520_v28  ;;  %v512_v4 = vmul.f32 %v857_v19, %v1218_v37 }
 0x2a2   : > { %533 = vst [vmem:[%s1251_s8 + $0x38] sm:$0xff] %v525_v3 }
 0x2a3   : > { %v524_v29 = vadd.f32 %v1193_v36, %v512_v4 }
 0x2a5   : > { %532 = vst [vmem:[%s1251_s8 + $0x30] sm:$0xff] %v524_v29 }
 0x2a6   : > { %929 = shalt.err (!%p926_p7)
}
 0x2a7   : > { %s930_s30 = scalar_lea.hbm %s1278_s11, 1024  ;;  %s934_s10 = scalar_lea.hbm %s1329_s3, 2048 }
 0x2a8   : > { %p931_p9 = scmp.ne.s32.totalorder %s1278_s11, %s930_s30  ;;  %p935_p5 = scmp.lt.u32.totalorder %s1278_s11, %s1329_s3 }
 0x2a9   : > { %p936_p11 = scmp.lt.u32.totalorder %s934_s10, %s930_s30  ;;  %p938_p4 = scmp.lt.u32.totalorder %s930_s30, %s1278_s11 }
 0x2aa   : > { %p932_p1 = pnand %p931_p9, %p1109_p12 }
 0x2ab   : > { %p937_p2 = por %p936_p11, %p935_p5 }
 0x2ac   : > { %p933_p0 = pneg %p932_p1 }
 0x2ad   : > { %p939_p6 = por %p938_p4, %p937_p2 }
 0x2af   : > { %p940_p8 = pnand %p939_p6, %p933_p0 }
 0x2b1   : > { %943 = shalt.err (!%p940_p8)
}
 0x2b2   : > { %s993_s20 = smov 128   ;;  %s994_s8 = smov 8  }
 0x2b3   : > { %771 = dma.vmem_to_hbm [thread:$0]  (%p1109_p12), %s1280_s4, 1024, %s1278_s11, %s535_s16, %s993_s20, %s993_s20, %s994_s8  }
 0x2b4 PF: > { %s563_s9 = sand.u32 1, %s974_s12   ;;  %p1344_p10 = scmp.ne.s32.totalorder %s1334_s19, 0 }
 0x2b5   : > { %p1345_p13 = scmp.ge.s32.totalorder %s986_s15, 2  ;;  %s564_s25 = scalar_lea.sflag [#allocation4], %s563_s9 }
 0x2b7   : > { %p782_p3 = pnand %p1345_p13, %p1344_p10 }
 0x2b9   : > { %969 = dma.done.wait (!%p782_p3), %s564_s25, 1024  }
 0x2ba   : > { %971 = vsyncadd (!%p782_p3), %s564_s25, 4294966272  ;;  %p17_p7 = scmp.ge.s32.totalorder %s1071_s24, 4   ;;  %s1346_s12 = smov %s978_s13 }
 0x2bb   : > { %s1347_s13 = smov %s982_s14  ;;  %s1348_s14 = smov %s1105_s17 }
 0x2bc   : > { %s1349_s15 = smov %s1071_s24  ;;  %19 = sbr.rel (!%p17_p7) target bundleno = 6 (0x6), region = 81 }
 0x2c3   :  { %569 = vsyncpa [#allocation3], 1 }
 0x2c4   :  { %571 = vsyncpa [#allocation3 + $0x1], 1 }
 0x2c5   :  { %572 = vsyncpa [#allocation6], 1 }
 0x2c6   :  { %573 = vsyncpa [#allocation4], 1 }
 0x2c7   :  { %575 = vsyncpa [#allocation4 + $0x1], 1 }

</bundles_post_ra>
